<compile_context>
chip_gen: v7x
topology: tpu7x:2x2x1
jax: 0.10.0
libtpu: 0.0.40
codegen_flags: <defaults>
</compile_context>

<pallas_src>
import functools

import jax
import jax.numpy as jnp
from jax import lax
from jax.experimental import pallas as pl
from jax.experimental.pallas import tpu as pltpu


def _round_up(x, m):
    return (x + m - 1) // m * m


# ---------------------------------------------------------------------------
# Kernel 1: single-KV-tile ("one pass") attention.  K/V block covers all keys,
# so softmax is computed in one shot; no scratch, no recurrence.
# ---------------------------------------------------------------------------
def _attn_onepass_kernel(q_ref, k_ref, v_ref, o_ref, *, n_keys, need_mask):
    # q_ref: (H, tq, D)   k_ref / v_ref: (H, Nk, D)   o_ref: (H, tq, D)
    scale = q_ref.shape[-1] ** (-0.5)      # static python float
    q = q_ref[...]
    k = k_ref[...]
    # sim[h, i, j] = sum_d q[h, i, d] * k[h, j, d]  (MXU, no transpose)
    sim = lax.dot_general(q, k, (((2,), (2,)), ((0,), (0,))),
                          preferred_element_type=jnp.float32)      # (H, tq, Nk) f32
    sim = sim * scale                                              # scale in f32

    if need_mask:
        # Mask padded key columns (global key index >= n_keys).
        col = lax.broadcasted_iota(jnp.int32, (1, 1, sim.shape[-1]), 2)
        sim = jnp.where(col < n_keys, sim, -jnp.inf)

    m = jnp.max(sim, axis=-1, keepdims=True)                       # (H, tq, 1)
    p = jnp.exp(sim - m)                                           # f32
    l = jnp.sum(p, axis=-1, keepdims=True)                         # (H, tq, 1)

    v = v_ref[...]
    pv = lax.dot_general(p.astype(v.dtype), v, (((2,), (1,)), ((0,), (0,))),
                         preferred_element_type=jnp.float32)       # (H, tq, D) f32
    o_ref[...] = (pv / l).astype(o_ref.dtype)                      # exact division


# ---------------------------------------------------------------------------
# Kernel 2: flash-style tiled attention with online softmax (large N fallback).
# ---------------------------------------------------------------------------
def _flash_attn_kernel(q_ref, k_ref, v_ref, o_ref, m_sc, l_sc, acc_sc,
                       *, n_keys, block_k, need_mask):
    # q_ref: (H, tq, D)   k_ref / v_ref: (H, tk, D)   o_ref: (H, tq, D)
    # m_sc / l_sc: (H, tq, 128) f32 (lane-replicated)   acc_sc: (H, tq, D) f32
    j = pl.program_id(2)

    @pl.when(j == 0)
    def _():
        m_sc[...] = jnp.full_like(m_sc, -jnp.inf)
        l_sc[...] = jnp.zeros_like(l_sc)
        acc_sc[...] = jnp.zeros_like(acc_sc)

    scale = q_ref.shape[-1] ** (-0.5)
    sim = lax.dot_general(q_ref[...], k_ref[...], (((2,), (2,)), ((0,), (0,))),
                          preferred_element_type=jnp.float32)      # (H, tq, tk) f32
    sim = sim * scale

    if need_mask:
        # Only the last kv tile holds padded keys; compare+select is cheap vs.
        # the exp on the same tile, so it is applied statically when the padded
        # path is selected.  TODO(synk): cond-gate to the last kv tile only.
        col = lax.broadcasted_iota(jnp.int32, (1, 1, block_k), 2) + j * block_k
        sim = jnp.where(col < n_keys, sim, -jnp.inf)

    # Online softmax with lane-replicated statistics.
    m_prev = m_sc[...]                                             # (H, tq, 128)
    m_new = jnp.maximum(m_prev, jnp.max(sim, axis=-1, keepdims=True))
    alpha = jnp.exp(m_prev - m_new)                                # (H, tq, 128)
    p = jnp.exp(sim - m_new[..., 0:1])                             # (H, tq, tk) f32

    l_sc[...] = alpha * l_sc[...] + jnp.sum(p, axis=-1, keepdims=True)
    v = v_ref[...]
    pv = lax.dot_general(p.astype(v.dtype), v, (((2,), (1,)), ((0,), (0,))),
                         preferred_element_type=jnp.float32)       # (H, tq, D) f32
    acc_sc[...] = alpha[..., 0:1] * acc_sc[...] + pv
    m_sc[...] = m_new

    @pl.when(j == pl.num_programs(2) - 1)
    def _():
        o_ref[...] = (acc_sc[...] / l_sc[..., 0:1]).astype(o_ref.dtype)


# ---------------------------------------------------------------------------
# Wrapper
# ---------------------------------------------------------------------------
def attention(q, k, v, *, block_q=256, block_k=256, kv_resident_max=2048,
              use_bf16=True):
    """Scaled dot-product attention. q: [B,H,Nq,D], k/v: [B,H,Nk,D] -> [B,H,Nq,D]."""
    B, H, Lq, D = q.shape
    Bk, Hk, Lk, Dk = k.shape
    assert v.shape == k.shape and (B, H, D) == (Bk, Hk, Dk)
    assert block_q % 8 == 0 and block_k % 8 == 0
    out_dtype = q.dtype

    # bf16 MXU operands + halved HBM traffic; accumulation stays f32 in-kernel.
    if use_bf16 and q.dtype == jnp.float32:
        q = q.astype(jnp.bfloat16)
        k = k.astype(jnp.bfloat16)
        v = v.astype(jnp.bfloat16)
    csize = jnp.dtype(q.dtype).itemsize

    def _pad_seq(x, target):
        pad = target - x.shape[2]
        if pad:
            x = jnp.pad(x, ((0, 0), (0, 0), (0, pad), (0, 0)))
        return x

    # q tiling (shared by both paths).
    tq = min(block_q, _round_up(Lq, 8))
    Nq = _round_up(Lq, tq)
    nq = Nq // tq
    qp = _pad_seq(q, Nq)

    # Rough VMEM budget check for keeping all of K/V resident per block.
    Nk_full = _round_up(Lk, 8)
    resident_bytes = (2 * 2 * H * Nk_full * D * csize          # K+V, double-buffered
                      + 4 * H * tq * D * (csize + 4)           # q / out blocks
                      + H * tq * Nk_full * (4 + csize))        # sim (f32) + p temps
    single_kv = (Lk <= kv_resident_max) and (resident_bytes <= 28 * 1024 * 1024)

    if single_kv:
        # One-pass path: K/V fetched once per batch (kv block index constant in i).
        Nk = Nk_full
        kp, vp = _pad_seq(k, Nk), _pad_seq(v, Nk)
        need_mask = Nk != Lk
        kernel = functools.partial(_attn_onepass_kernel, n_keys=Lk,
                                   need_mask=need_mask)
        grid = (B, nq)
        q_spec = pl.BlockSpec((None, H, tq, D), lambda b, i: (b, 0, i, 0))
        kv_spec = pl.BlockSpec((None, H, Nk, D), lambda b, i: (b, 0, 0, 0))
        o_spec = pl.BlockSpec((None, H, tq, D), lambda b, i: (b, 0, i, 0))
        scratch = []
        semantics = ("parallel", "parallel")
    else:
        # Flash-tiled path with online softmax.
        tk = min(block_k, _round_up(Lk, 8))
        Nk = _round_up(Lk, tk)
        nkv = Nk // tk
        kp, vp = _pad_seq(k, Nk), _pad_seq(v, Nk)
        need_mask = Nk != Lk
        kernel = functools.partial(_flash_attn_kernel, n_keys=Lk, block_k=tk,
                                   need_mask=need_mask)
        grid = (B, nq, nkv)
        q_spec = pl.BlockSpec((None, H, tq, D), lambda b, i, j: (b, 0, i, 0))
        kv_spec = pl.BlockSpec((None, H, tk, D), lambda b, i, j: (b, 0, j, 0))
        o_spec = pl.BlockSpec((None, H, tq, D), lambda b, i, j: (b, 0, i, 0))
        scratch = [
            pltpu.VMEM((H, tq, 128), jnp.float32),   # running max m (lane-replicated)
            pltpu.VMEM((H, tq, 128), jnp.float32),   # running sum l (lane-replicated)
            pltpu.VMEM((H, tq, D), jnp.float32),     # output accumulator
        ]
        semantics = ("parallel", "parallel", "arbitrary")

    out = pl.pallas_call(
        kernel,
        out_shape=jax.ShapeDtypeStruct((B, H, Nq, D), out_dtype),
        grid_spec=pltpu.PrefetchScalarGridSpec(
            num_scalar_prefetch=0,
            grid=grid,
            in_specs=[q_spec, kv_spec, kv_spec],
            out_specs=o_spec,
            scratch_shapes=scratch,
        ),
        compiler_params=pltpu.CompilerParams(
            dimension_semantics=semantics,
            vmem_limit_bytes=48 * 1024 * 1024,
        ),
    )(qp, kp, vp)

    if Nq != Lq:
        out = out[:, :, :Lq, :]
    return out


def _attention_ref(q, k, v):
    """Pure-JAX f32 reference mirroring the PyTorch math path."""
    s = q.shape[-1] ** (-0.5)
    sim = jnp.einsum('...id,...jd->...ij', q, k,
                     precision=jax.lax.Precision.HIGHEST) * s
    attn = jax.nn.softmax(sim, axis=-1)
    return jnp.einsum('...ij,...jd->...id', attn, v,
                      precision=jax.lax.Precision.HIGHEST)


if __name__ == "__main__":
    root = jax.random.PRNGKey(0)

    cases = [
        # (B, H, N, D, kwargs) - shapes consistent with LightGlue usage.
        (2, 4, 8, 32, {}),                                  # tiny, one-pass path
        (1, 4, 197, 64, {}),                                # one-pass path + key padding mask
        (2, 2, 200, 32, dict(kv_resident_max=0,             # force flash-tiled path
                             block_q=128, block_k=64)),     # (multi kv tiles + padding)
    ]

    for idx, (B, H, N, D, kw) in enumerate(cases):
        kq, kk, kv_, root = jax.random.split(root, 4)
        q = jax.random.normal(kq, (B, H, N, D), dtype=jnp.float32)
        k = jax.random.normal(kk, (B, H, N, D), dtype=jnp.float32)
        v = jax.random.normal(kv_, (B, H, N, D), dtype=jnp.float32)

        out = jax.block_until_ready(attention(q, k, v, **kw))
        ref = _attention_ref(q, k, v)
        assert out.shape == ref.shape, f"case {idx}: shape {out.shape} vs {ref.shape}"
        err = float(jnp.max(jnp.abs(out.astype(jnp.float32) - ref)))
        # bf16 MXU operands (matching the module's half-precision flash path on
        # CUDA) with f32 accumulation: typical error a few e-3; margin added.
        assert err < 3e-2, f"case {idx}: max abs err {err} vs reference"

    print("KERNEL_OK")
</pallas_src>

<mosaic_0001>
module attributes {stable_mosaic.version = 11 : i64} {
  func.func @_attn_onepass_kernel(%arg0: i32, %arg1: i32, %arg2: memref<1x4x8x32xbf16, #tpu.memory_space<vmem>>, %arg3: memref<1x4x8x32xbf16, #tpu.memory_space<vmem>>, %arg4: memref<1x4x8x32xbf16, #tpu.memory_space<vmem>>, %arg5: memref<1x4x8x32xf32, #tpu.memory_space<vmem>>) attributes {dimension_semantics = [#tpu.dimension_semantics<parallel>, #tpu.dimension_semantics<parallel>], iteration_bounds = array<i64: 2, 1>, scalar_prefetch = 0 : i64, scratch_operands = 0 : i64, tpu.core_type = #tpu.core_type<tc>, window_params = [{transform_indices = @transform_0, window_bounds = array<i64: 1, 4, 8, 32>}, {transform_indices = @transform_1, window_bounds = array<i64: 1, 4, 8, 32>}, {transform_indices = @transform_2, window_bounds = array<i64: 1, 4, 8, 32>}, {transform_indices = @transform_3, window_bounds = array<i64: 1, 4, 8, 32>}]} {
    %c0 = arith.constant 0 : index
    %c0_0 = arith.constant 0 : index
    %c0_1 = arith.constant 0 : index
    %c0_2 = arith.constant 0 : index
    %0 = vector.load %arg2[%c0, %c0_0, %c0_1, %c0_2] : memref<1x4x8x32xbf16, #tpu.memory_space<vmem>>, vector<1x4x8x32xbf16>
    %1 = vector.shape_cast %0 : vector<1x4x8x32xbf16> to vector<4x8x32xbf16>
    %c0_3 = arith.constant 0 : index
    %c0_4 = arith.constant 0 : index
    %c0_5 = arith.constant 0 : index
    %c0_6 = arith.constant 0 : index
    %2 = vector.load %arg3[%c0_3, %c0_4, %c0_5, %c0_6] : memref<1x4x8x32xbf16, #tpu.memory_space<vmem>>, vector<1x4x8x32xbf16>
    %3 = vector.shape_cast %2 : vector<1x4x8x32xbf16> to vector<4x8x32xbf16>
    %cst = arith.constant dense<0.000000e+00> : vector<4x8x8xf32>
    %4 = tpu.matmul %1, %3, %cst {dimension_numbers = #tpu.dot_dimension_numbers<[2], [2], [1], [1], [0, 0, 0, 1, 1, 1], [0], [0]>} : vector<4x8x32xbf16>, vector<4x8x32xbf16>, vector<4x8x8xf32> -> vector<4x8x8xf32>
    %cst_7 = arith.constant 0.176776692 : f32
    %5 = vector.broadcast %cst_7 : f32 to vector<4x8x8xf32>
    %6 = arith.mulf %4, %5 : vector<4x8x8xf32>
    %cst_8 = arith.constant dense<0xFF800000> : vector<4x8xf32>
    %7 = vector.multi_reduction <maximumf>, %6, %cst_8 [2] : vector<4x8x8xf32> to vector<4x8xf32>
    %8 = vector.shape_cast %7 : vector<4x8xf32> to vector<4x8x1xf32>
    %9 = vector.broadcast %8 : vector<4x8x1xf32> to vector<4x8x8xf32>
    %10 = arith.subf %6, %9 : vector<4x8x8xf32>
    %11 = math.exp %10 : vector<4x8x8xf32>
    %cst_9 = arith.constant dense<0.000000e+00> : vector<4x8xf32>
    %12 = vector.multi_reduction <add>, %11, %cst_9 [2] : vector<4x8x8xf32> to vector<4x8xf32>
    %13 = vector.shape_cast %12 : vector<4x8xf32> to vector<4x8x1xf32>
    %c0_10 = arith.constant 0 : index
    %c0_11 = arith.constant 0 : index
    %c0_12 = arith.constant 0 : index
    %c0_13 = arith.constant 0 : index
    %14 = vector.load %arg4[%c0_10, %c0_11, %c0_12, %c0_13] : memref<1x4x8x32xbf16, #tpu.memory_space<vmem>>, vector<1x4x8x32xbf16>
    %15 = vector.shape_cast %14 : vector<1x4x8x32xbf16> to vector<4x8x32xbf16>
    %16 = arith.truncf %11 : vector<4x8x8xf32> to vector<4x8x8xbf16>
    %cst_14 = arith.constant dense<0.000000e+00> : vector<4x8x32xf32>
    %17 = tpu.matmul %16, %15, %cst_14 {dimension_numbers = #tpu.dot_dimension_numbers<[2], [1], [1], [2], [0, 0, 0, 1, 1, 2], [0], [0]>} : vector<4x8x8xbf16>, vector<4x8x32xbf16>, vector<4x8x32xf32> -> vector<4x8x32xf32>
    %18 = vector.broadcast %13 : vector<4x8x1xf32> to vector<4x8x32xf32>
    %19 = arith.divf %17, %18 : vector<4x8x32xf32>
    %c0_15 = arith.constant 0 : index
    %c0_16 = arith.constant 0 : index
    %c0_17 = arith.constant 0 : index
    %c0_18 = arith.constant 0 : index
    %20 = vector.load %arg5[%c0_15, %c0_16, %c0_17, %c0_18] : memref<1x4x8x32xf32, #tpu.memory_space<vmem>>, vector<1x4x8x32xf32>
    %21 = vector.shape_cast %20 : vector<1x4x8x32xf32> to vector<4x8x32xf32>
    %22 = vector.shape_cast %19 : vector<4x8x32xf32> to vector<1x4x8x32xf32>
    tpu.vector_store %arg5[%c0_15, %c0_16, %c0_17, %c0_18], %22 {strides = array<i32>} : memref<1x4x8x32xf32, #tpu.memory_space<vmem>>, vector<1x4x8x32xf32>,
    return
  }
  func.func @transform_0(%arg0: i32, %arg1: i32) -> (i32, i32, i32, i32) {
    %c0_i32 = arith.constant 0 : i32
    %c0_i32_0 = arith.constant 0 : i32
    %c0_i32_1 = arith.constant 0 : i32
    return %arg0, %c0_i32, %arg1, %c0_i32_0 : i32, i32, i32, i32
  }
  func.func @transform_1(%arg0: i32, %arg1: i32) -> (i32, i32, i32, i32) {
    %c0_i32 = arith.constant 0 : i32
    %c0_i32_0 = arith.constant 0 : i32
    %c0_i32_1 = arith.constant 0 : i32
    %c0_i32_2 = arith.constant 0 : i32
    return %arg0, %c0_i32, %c0_i32_0, %c0_i32_1 : i32, i32, i32, i32
  }
  func.func @transform_2(%arg0: i32, %arg1: i32) -> (i32, i32, i32, i32) {
    %c0_i32 = arith.constant 0 : i32
    %c0_i32_0 = arith.constant 0 : i32
    %c0_i32_1 = arith.constant 0 : i32
    %c0_i32_2 = arith.constant 0 : i32
    return %arg0, %c0_i32, %c0_i32_0, %c0_i32_1 : i32, i32, i32, i32
  }
  func.func @transform_3(%arg0: i32, %arg1: i32) -> (i32, i32, i32, i32) {
    %c0_i32 = arith.constant 0 : i32
    %c0_i32_0 = arith.constant 0 : i32
    %c0_i32_1 = arith.constant 0 : i32
    return %arg0, %c0_i32, %arg1, %c0_i32_0 : i32, i32, i32, i32
  }
}

</mosaic_0001>

<bundles_post_ra>
// kernel: tpu_custom_call.1
= control target key start
LH: loop header
LB: loop body
LE: loop exit
PB: predicated region body
PF: predicated region fallthrough
CT: control target
= control target key end

     0   :  { %s1605_s0 = inlined_call_operand.hbm [shape: bf16[2,4,8,32], index: 0, kind: input, shape index: {}]   ;;  %s1606_s1 = inlined_call_operand.hbm [shape: bf16[2,4,8,32], index: 1, kind: input, shape index: {}]   ;;  %s1607_s2 = inlined_call_operand.hbm [shape: bf16[2,4,8,32], index: 2, kind: input, shape index: {}]   ;;  %s1608_s3 = inlined_call_operand.hbm [shape: f32[2,4,8,32], index: 3, kind: output, shape index: {}]  }
   0x1   :  { %1618 = sst [smem:[#allocation15_spill]] %s1606_s1 }
   0x2   :  { %8 = vsyncpa [#allocation3], 0 }
   0x3   :  { %10 = vsyncpa [#allocation3 + $0x1], 0 }
   0x4   :  { %11 = vsyncpa [#allocation6], 0 }
   0x5   :  { %13 = vsyncpa [#allocation6 + $0x1], 0 }
   0x6   :  { %14 = vsyncpa [#allocation4], 0 }
   0x7   :  { %16 = vsyncpa [#allocation4 + $0x1], 0  ;;  %s1267_s12 = smov 0   ;;  %s1269_s13 = smov 0  }
   0x8   :  { %s1271_s14 = smov 0   ;;  %s1273_s15 = smov 0  }
   0x9   :  { %s1275_s16 = smov 0   ;;  %s1277_s17 = smov 0  }
   0xa LB: > { %1619 = sst [smem:[#allocation12_spill]] %s1231_s16  ;;  %s1298_s18 = sadd.s32 4294967295, %s1235_s17   ;;  %s1235_s17 = sphi %s1277_s17, %s22_s17   ;;  %s1231_s16 = sphi %s1275_s16, %s1646_s16   ;;  %s1227_s15 = sphi %s1273_s15, %s1641_s15   ;;  %s1223_s14 = sphi %s1271_s14, %s1645_s14   ;;  %s1219_s13 = sphi %s1269_s13, %s1644_s13   ;;  %s1215_s12 = sphi %s1267_s12, %s1643_s12  }
   0xb   : > { %s867_s19 = sadd.s32 4294967294, %s1235_s17   ;;  %s34_s20 = sadd.s32 1, %s1231_s16 }
   0xc   : > { %s43_s21 = sadd.s32 1, %s1223_s14  ;;  %p36_p0 = scmp.ge.s32.totalorder %s34_s20, 2 }
   0xd   : > { %p50_p1 = scmp.ne.s32.totalorder %s1223_s14, %s1219_s13  ;;  %p51_p2 = scmp.eq.s32.totalorder %s1235_s17, 0 }
   0xe   : > { %p56_p3 = scmp.ne.s32.totalorder %s1219_s13, %s1215_s12  ;;  %s1648_s20 = smov (%p36_p0, %s34_s20), 0 }
   0xf   : > { %1620 = sst [smem:[#allocation13_spill]] %s1648_s20  ;;  %p1310_p4 = por %p51_p2, %p50_p1 }
  0x10   : > { %p57_p5 = scmp.eq.s32.totalorder %s1298_s18, 0  ;;  %s38_s23 = ssub.s32 %s1231_s16, %s1648_s20 }
  0x11   : > { %p134_p6 = scmp.eq.s32.totalorder %s1298_s18, 1  ;;  %p41_p7 = scmp.eq.s32.totalorder %s38_s23, 0 }
  0x12   : > { %p1318_p8 = por %p57_p5, %p56_p3  ;;  %p140_p10 = scmp.eq.s32.totalorder %s867_s19, 1 }
  0x13   : > { %p1322_p9 = por %p134_p6, %p50_p1  ;;  %p987_p13 = scmp.lt.s32.totalorder %s1235_s17, 2 }
  0x14   : > { %s1622_s24 = scalar_select %p1318_p8, 1, 0 }
  0x15   : > { %s1623_s25 = scalar_select %p1322_p9, 1, 0 }
  0x16   : > { %s1327_s26 = scalar_select %p41_p7, %s1223_s14, %s43_s21  }
  0x17   : > { %p1329_p11 = por %p140_p10, %p56_p3  ;;  %s1611_s28 = sand.u32 1, %s1223_s14  }
  0x18   : > { %1624 = sst [smem:[#allocation14_spill]] %s1327_s26  ;;  %s1338_s29 = sshll.u32 %s1611_s28, 4 }
  0x19   : > { %s1625_s27 = scalar_select %p1329_p11, 1, 0 }
  0x1a   : > { %s1341_s30 = sshll.u32 %s1231_s16, 8  ;;  %p1345_p0 = pnand %p987_p13, %p1310_p4 }
  0x1b   : > { %s182_s5 = sand.u32 1, %s1235_s17   ;;  %s1627_s1 = sld [smem:[#allocation15_spill]] }
  0x1c   : > { %s186_s9 = scalar_lea.vmem [#allocation5], %s1338_s29  ;;  %s1361_s11 = scalar_lea.sflag [#allocation6], %s182_s5 }
  0x1d   : > { %s193_s10 = sshll.u32 %s186_s9, 4  ;;  %p1367_p4 = pneg %p1345_p0  ;;  %s1358_s10 = int_to_ptr.vmem [resolvable:$true] %s193_s10 }
  0x21   : > { %s1354_s8 = scalar_lea.hbm %s1627_s1, %s1341_s30  ;;  %s1064_s6 = scalar_lea.hbm %s1627_s1, 512 }
  0x22   : > { %s1059_s19 = scalar_lea.hbm %s1354_s8, 256  ;;  %p1065_p7 = scmp.lt.u32.totalorder %s1354_s8, %s1627_s1 }
  0x23   : > { %p1060_p3 = scmp.ne.s32.totalorder %s1354_s8, %s1059_s19  ;;  %p1066_p10 = scmp.lt.u32.totalorder %s1064_s6, %s1059_s19 }
  0x24   : > { %p1068_p12 = scmp.lt.u32.totalorder %s1059_s19, %s1354_s8 }
  0x25   : > { %p1062_p5 = pnand %p1367_p4, %p1060_p3  ;;  %p1067_p13 = por %p1066_p10, %p1065_p7 }
  0x27   : > { %p1063_p6 = pneg %p1062_p5  ;;  %p1069_p1 = por %p1068_p12, %p1067_p13 }
  0x29   : > { %p1070_p2 = pnand %p1069_p1, %p1063_p6 }
  0x2b   : > { %1073 = shalt.err (!%p1070_p2)
}
  0x2c   : > { %s1074_s5 = scalar_lea.vmem %s1358_s10, 256  ;;  %s1237_s22 = smov [#allocation5]  }
  0x2d   : > { %p1075_p3 = scmp.ne.s32.totalorder %s1358_s10, %s1074_s5  ;;  %s1079_s23 = sshll.u32 %s1237_s22, 4  ;;  %s1080_s23 = int_to_ptr.vmem [resolvable:$false] %s1079_s23 }
  0x2e   : > { %s1081_s7 = scalar_lea.vmem %s1080_s23, 512  ;;  %p1082_p9 = scmp.lt.s32.totalorder %s1358_s10, %s1080_s23 }
  0x2f   : > { %p1077_p5 = pnand %p1075_p3, %p1367_p4  ;;  %p1083_p8 = scmp.lt.s32.totalorder %s1081_s7, %s1074_s5 }
  0x31   : > { %p1078_p11 = pneg %p1077_p5  ;;  %p1084_p7 = por %p1083_p8, %p1082_p9 }
  0x33   : > { %p1085_p10 = pnand %p1084_p7, %p1078_p11 }
  0x35   : > { %1088 = shalt.err (!%p1085_p10)
}
  0x36   : > { %s1612_s19 = smov 64   ;;  %s1614_s6 = smov 4  }
  0x37   : > { %979 = dma.hbm_to_vmem [thread:$0]  (!%p1345_p0), %s1354_s8, 256, %s1358_s10, %s1361_s11, %s1612_s19, %s1612_s19, %s1614_s6  }
  0x38   : > { %p1629_p8 = scmp.lt.s32.totalorder %s1235_s17, 3  ;;  %p1630_p9 = scmp.ge.s32.totalorder %s1235_s17, 1 }
  0x39   : > { %s1406_s23 = scalar_lea.hbm %s1605_s0, %s1341_s30  ;;  %s164_s7 = scalar_lea.vmem [#allocation2], %s1338_s29 }
  0x3a   : > { %p1398_p11 = pnand %p1630_p9, %p1629_p8  ;;  %s172_s28 = sshll.u32 %s164_s7, 4  ;;  %s1409_s28 = int_to_ptr.vmem [resolvable:$true] %s172_s28 }
  0x3b   : > { %s1415_s19 = scalar_lea.hbm %s1607_s2, %s1341_s30  ;;  %s1632_s6 = sand.u32 1, %s1223_s14  }
  0x3c   : > { %s1631_s9 = scalar_select %p1398_p11, 1, 0 }
  0x3d   : > { %s1419_s1 = scalar_lea.sflag [#allocation3], %s1632_s6  ;;  %s1089_s20 = scalar_lea.hbm %s1406_s23, 256 }
  0x3e   : > { %p1090_p12 = scmp.ne.s32.totalorder %s1406_s23, %s1089_s20  ;;  %s1094_s16 = scalar_lea.hbm %s1605_s0, 512 }
  0x3f   : > { %p1095_p6 = scmp.lt.u32.totalorder %s1406_s23, %s1605_s0  ;;  %p1096_p13 = scmp.lt.u32.totalorder %s1094_s16, %s1089_s20 }
  0x40   : > { %p1092_p1 = pnand %p1090_p12, %p1367_p4  ;;  %p1098_p5 = scmp.lt.u32.totalorder %s1089_s20, %s1406_s23 }
  0x41   : > { %p1097_p3 = por %p1096_p13, %p1095_p6 }
  0x42   : > { %p1093_p2 = pneg %p1092_p1 }
  0x43   : > { %p1099_p7 = por %p1098_p5, %p1097_p3 }
  0x45   : > { %p1100_p10 = pnand %p1099_p7, %p1093_p2 }
  0x47   : > { %1103 = shalt.err (!%p1100_p10)
}
  0x48   : > { %s1104_s30 = scalar_lea.vmem %s1409_s28, 256  ;;  %s1240_s6 = smov [#allocation2]  }
  0x49   : > { %p1105_p8 = scmp.ne.s32.totalorder %s1409_s28, %s1104_s30  ;;  %s1109_s8 = sshll.u32 %s1240_s6, 4  ;;  %s1110_s8 = int_to_ptr.vmem [resolvable:$false] %s1109_s8 }
  0x4a   : > { %s1111_s26 = scalar_lea.vmem %s1110_s8, 512  ;;  %p1112_p1 = scmp.lt.s32.totalorder %s1409_s28, %s1110_s8 }
  0x4b   : > { %p1107_p9 = pnand %p1105_p8, %p1367_p4  ;;  %p1113_p11 = scmp.lt.s32.totalorder %s1111_s26, %s1104_s30 }
  0x4d   : > { %p1108_p12 = pneg %p1107_p9  ;;  %p1114_p6 = por %p1113_p11, %p1112_p1 }
  0x4f   : > { %p1115_p13 = pnand %p1114_p6, %p1108_p12 }
  0x51   : > { %1118 = shalt.err (!%p1115_p13)
}
  0x52   : > { %s1633_s16 = smov 4   ;;  %s1634_s20 = smov 64  }
  0x53   : > { %976 = dma.hbm_to_vmem [thread:$0]  (!%p1345_p0), %s1406_s23, 256, %s1409_s28, %s1419_s1, %s1634_s20, %s1634_s20, %s1633_s16  }
  0x54   : > { %s207_s10 = scalar_lea.vmem [#allocation7], %s1338_s29  ;;  %s1119_s22 = scalar_lea.hbm %s1415_s19, 256 }
  0x55   : > { %s214_s5 = sshll.u32 %s207_s10, 4  ;;  %p1120_p11 = scmp.ne.s32.totalorder %s1415_s19, %s1119_s22  ;;  %s1447_s5 = int_to_ptr.vmem [resolvable:$true] %s214_s5 }
  0x56   : > { %s1124_s6 = scalar_lea.hbm %s1607_s2, 512  ;;  %p1125_p5 = scmp.lt.u32.totalorder %s1415_s19, %s1607_s2 }
  0x57   : > { %p1122_p2 = pnand %p1120_p11, %p1367_p4  ;;  %p1126_p7 = scmp.lt.u32.totalorder %s1124_s6, %s1119_s22 }
  0x58   : > { %p1128_p8 = scmp.lt.u32.totalorder %s1119_s22, %s1415_s19 }
  0x59   : > { %p1123_p3 = pneg %p1122_p2  ;;  %p1127_p10 = por %p1126_p7, %p1125_p5 }
  0x5b   : > { %p1129_p9 = por %p1128_p8, %p1127_p10 }
  0x5d   : > { %p1130_p12 = pnand %p1129_p9, %p1123_p3 }
  0x5f   : > { %1133 = shalt.err (!%p1130_p12)
}
  0x60   : > { %s1134_s1 = scalar_lea.vmem %s1447_s5, 256  ;;  %s1241_s28 = smov [#allocation7]  }
  0x61   : > { %p1135_p1 = scmp.ne.s32.totalorder %s1447_s5, %s1134_s1  ;;  %s1139_s29 = sshll.u32 %s1241_s28, 4  ;;  %s1140_s29 = int_to_ptr.vmem [resolvable:$false] %s1139_s29 }
  0x62   : > { %s1141_s23 = scalar_lea.vmem %s1140_s29, 512  ;;  %p1142_p11 = scmp.lt.s32.totalorder %s1447_s5, %s1140_s29 }
  0x63   : > { %p1137_p6 = pnand %p1135_p1, %p1367_p4  ;;  %p1143_p2 = scmp.lt.s32.totalorder %s1141_s23, %s1134_s1 }
  0x65   : > { %p1138_p13 = pneg %p1137_p6  ;;  %p1144_p5 = por %p1143_p2, %p1142_p11 }
  0x67   : > { %p1145_p7 = pnand %p1144_p5, %p1138_p13 }
  0x69   : > { %1148 = shalt.err (!%p1145_p7)
}
  0x6a   : > { %982 = dma.hbm_to_vmem [thread:$0]  (!%p1345_p0), %s1415_s19, 256, %s1447_s5, %s1361_s11, %s1634_s20, %s1634_s20, %s1633_s16  }
  0x6b   : > { %p1635_p4 = scmp.ne.s32.totalorder %s1631_s9, 0 }
  0x6c   : > { %s1477_s21 = sand.u32 (!%p1635_p4), 1, %s1219_s13   ;;  %p1636_p3 = scmp.ne.s32.totalorder (!%p1635_p4), %s1622_s24, 0 }
  0x6d   : > { %226 = sbr.rel (%p1635_p4) target bundleno = 745 (0x2e9), region = 32  ;;  %s1480_s10 = sshll.u32 (!%p1635_p4), %s1477_s21, 4 }
  0x6e   : > { %s229_s4 = scalar_lea.sflag (!%p1635_p4), [#allocation3], %s1477_s21  ;;  %s1484_s22 = scalar_lea.vmem (!%p1635_p4), [#allocation2], %s1480_s10 }
  0x74   : > { %1202 = dma.done.wait (%p1636_p3), %s229_s4, 256  }
  0x75   : > { %1204 = vsyncadd (%p1636_p3), %s229_s4, 4294967040  ;;  %s237_s11 = sand.u32 1, %s1298_s18   ;;  %s241_s9 = scalar_lea.vmem [#allocation5], %s1480_s10 }
  0x76   : > { %s238_s19 = scalar_lea.sflag [#allocation6], %s237_s11 }
  0x77   : > { %1206 = dma.done.wait (%p1636_p3), %s238_s19, 512  }
  0x78   : > { %1208 = vsyncadd (%p1636_p3), %s238_s19, 4294966784  ;;  %v1242_v0 = vmov 0.0   ;;  %vm1243_vm0 = vmmov 0   ;;  %vm292_vm1 = vcmask 261120   ;;  %v288_v1 = vld [vmem:[%s241_s9] sm:$0xf] }
  0x79   : > { %917 = vmatprep.subr.bf16.mxu0 %v1242_v0  ;;  %923 = vmatprep.subr.bf16.mxu1 %v1242_v0  ;;  %v289_v2 = vld [vmem:[%s241_s9 + $0x4] sm:$0xf]  ;;  %v297_v3 = vsel %vm292_vm1, %v288_v1, 0  ;;  %v290_v5 = vld [vmem:[%s241_s9 + $0x8] sm:$0xf]  ;;  %vm481_vm2 = vcmask 64512  }
  0x7a   : > { %919 = vmatprep.mubr.msk.bf16.mxu0 %vm1243_vm0, %v1242_v0  ;;  %925 = vmatprep.mubr.msk.bf16.mxu1 %vm1243_vm0, %v1242_v0  ;;  %v343_v4 = vsel %vm292_vm1, %v289_v2, 0  ;;  %v291_v6 = vld [vmem:[%s241_s9 + $0xc] sm:$0xf]  ;;  %v284_v7 = vld [vmem:[%s1484_s22] sm:$0xf]  ;;  %v389_v9 = vsel %vm292_vm1, %v290_v5, 0 }
  0x7b   : > { %918 = vmatpush3.bf16.xpose.msra.mxu0 %v297_v3  ;;  %924 = vmatpush3.bf16.xpose.msra.mxu1 %v343_v4  ;;  %v285_v8 = vld [vmem:[%s1484_s22 + $0x4] sm:$0xf]  ;;  %v435_v10 = vsel %vm292_vm1, %v291_v6, 0  ;;  %v286_v11 = vld [vmem:[%s1484_s22 + $0x8] sm:$0xf]  ;;  %s250_s18 = scalar_lea.vmem [#allocation7], %s1480_s10 }
  0x7c   : > { %929 = vmatprep.subr.bf16.mxu0 %v1242_v0  ;;  %935 = vmatprep.subr.bf16.mxu1 %v1242_v0  ;;  %v287_v12 = vld [vmem:[%s1484_s22 + $0xc] sm:$0xf]  ;;  %v518_v37 = vld [vmem:[%s250_s18] sm:$0xf]  ;;  %vm529_vm3 = vcmask 1043456   ;;  %s883_s24 = sshll.u32 %s1477_s21, 5 }
  0x7d   : > { %v531_v38 = vsel %vm529_vm3, %v518_v37, 0  ;;  %v519_v39 = vld [vmem:[%s250_s18 + $0x4] sm:$0xf]  ;;  %v520_v41 = vld [vmem:[%s250_s18 + $0x8] sm:$0xf]  ;;  %s282_s16 = scalar_lea.vmem [#allocation8], %s883_s24 }
  0x7e   : > { %v577_v40 = vsel %vm529_vm3, %v519_v39, 0  ;;  %v623_v42 = vsel %vm529_vm3, %v520_v41, 0  ;;  %v521_v43 = vld [vmem:[%s250_s18 + $0xc] sm:$0xf]  ;;  %s738_s20 = sshll.u32 %s282_s16, 4  ;;  %s900_s5 = sshll.u32 %s1227_s15, 9  ;;  %s1549_s20 = int_to_ptr.vmem [resolvable:$true] %s738_s20 }
  0x7f   : > { %v669_v44 = vsel %vm529_vm3, %v521_v43, 0  ;;  %s1555_s6 = scalar_lea.hbm %s1608_s3, %s900_s5  ;;  %s724_s15 = scalar_lea.sflag [#allocation4], %s1477_s21 }
  0x80   : > { %s1149_s8 = scalar_lea.vmem %s1549_s20, 512  ;;  %p1637_p10 = scmp.ne.s32.totalorder %s1623_s25, 0 }
  0x81   : > { %p1150_p0 = scmp.ne.s32.totalorder %s1549_s20, %s1149_s8  ;;  %s1244_s26 = smov [#allocation8]  }
  0x82   : > { %920 = vmatmul.mubr.msk.bf16.vlgmr.msra.gmra.mrb[0].mxu0 %vm292_vm1, %v284_v7  ;;  %926 = vmatmul.mubr.msk.bf16.vlgmr.msra.gmra.mrb[0].mxu1 %vm292_vm1, %v285_v8  ;;  %s1153_s1 = sshll.u32 %s1244_s26, 4  ;;  %s1154_s1 = int_to_ptr.vmem [resolvable:$false] %s1153_s1 }
  0x83   : > { %930 = vmatpush3.bf16.xpose.msra.mxu0 %v389_v9  ;;  %936 = vmatpush3.bf16.xpose.msra.mxu1 %v435_v10  ;;  %p1151_p8 = pnand %p1150_p0, %p1637_p10  ;;  %s1155_s28 = scalar_lea.vmem %s1154_s1, 1024 }
  0x84   : > { %931 = vmatprep.mubr.msk.bf16.mxu0 %vm1243_vm0, %v1242_v0  ;;  %937 = vmatprep.mubr.msk.bf16.mxu1 %vm1243_vm0, %v1242_v0  ;;  %p1156_p12 = scmp.lt.s32.totalorder %s1549_s20, %s1154_s1  ;;  %p1157_p1 = scmp.lt.s32.totalorder %s1155_s28, %s1149_s8 }
  0x85   : > { %941 = vmatprep.subr.bf16.mxu0 %v1242_v0  ;;  %947 = vmatprep.subr.bf16.mxu1 %v1242_v0  ;;  %p1152_p9 = pneg %p1151_p8 }
  0x86   : > { %p1158_p6 = por %p1157_p1, %p1156_p12 }
  0x88   : > { %p1159_p13 = pnand %p1158_p6, %p1152_p9 }
  0x8a   : > { %932 = vmatmul.mubr.msk.bf16.vlgmr.msra.gmra.mrb[4].mxu0 %vm292_vm1, %v286_v11  ;;  %938 = vmatmul.mubr.msk.bf16.vlgmr.msra.gmra.mrb[4].mxu1 %vm292_vm1, %v287_v12 }
  0x8b   : > { %943 = vmatprep.mubr.msk.bf16.mxu0 %vm1243_vm0, %v1242_v0  ;;  %949 = vmatprep.mubr.msk.bf16.mxu1 %vm1243_vm0, %v1242_v0 }
  0x8c   : > { %942 = vmatpush3.bf16.msra.mxu0 %v531_v38  ;;  %948 = vmatpush3.bf16.msra.mxu1 %v577_v40 }
  0x8d   : > { %953 = vmatprep.subr.bf16.mxu0 %v1242_v0  ;;  %959 = vmatprep.subr.bf16.mxu1 %v1242_v0 }
 0x155   : > { %v333_v13 = vpop.f32.mrb[0].mxu0  ;;  %v379_v14 = vpop.f32.mrb[0].mxu1 }
 0x156   : > { %v477_v15 = vmul.f32 0.17677669, %v333_v13  ;;  %v921_v16 = vpop.f32.mrb[1].mxu0  ;;  %v478_v17 = vmul.f32 0.17677669, %v379_v14  ;;  %v927_v18 = vpop.f32.mrb[1].mxu1 }
 0x157   : > { %v336_v19 = vpop.f32.mrb[2].mxu0  ;;  %v382_v20 = vpop.f32.mrb[2].mxu1 }
 0x158   : > { %v922_v21 = vpop.f32.mrb[3].mxu0  ;;  %v482_v22 = vsel %vm481_vm2, %v477_v15, -inf  ;;  %v928_v23 = vpop.f32.mrb[3].mxu1  ;;  %v485_v24 = vsel %vm481_vm2, %v478_v17, -inf }
 0x159   : > { %483 = vmax.xlane.f32.xlu0 %v482_v22 }
 0x15d   : > { %486 = vmax.xlane.f32.xlu0 %v485_v24  ;;  %v425_v25 = vpop.f32.mrb[4].mxu0  ;;  %v471_v26 = vpop.f32.mrb[4].mxu1 }
 0x15e   : > { %v479_v27 = vmul.f32 0.17677669, %v425_v25  ;;  %v933_v28 = vpop.f32.mrb[5].mxu0  ;;  %v480_v29 = vmul.f32 0.17677669, %v471_v26  ;;  %v939_v30 = vpop.f32.mrb[5].mxu1 }
 0x15f   : > { %v428_v31 = vpop.f32.mrb[6].mxu0  ;;  %v474_v32 = vpop.f32.mrb[6].mxu1 }
 0x160   : > { %v934_v33 = vpop.f32.mrb[7].mxu0  ;;  %v488_v34 = vsel %vm481_vm2, %v479_v27, -inf  ;;  %v940_v35 = vpop.f32.mrb[7].mxu1  ;;  %v491_v36 = vsel %vm481_vm2, %v480_v29, -inf }
 0x161   : > { %489 = vmax.xlane.f32.xlu1 %v488_v34 }
 0x165   : > { %492 = vmax.xlane.f32.xlu1 %v491_v36 }
 0x1e6   : > { %v484_v45 = vpop.xlane.xlu0 %483 }
 0x1e7   : > { %v494_v46 = vsub.f32 %v477_v15, %v484_v45 }
 0x1e9   : > { %v498_v47 = vmul.f32 1.442695, %v494_v46 }
 0x1ea   : > { %v487_v48 = vpop.xlane.xlu0 %486 }
 0x1eb   : > { %1043 = vpow2.f32 %v498_v47  ;;  %v495_v49 = vsub.f32 %v478_v17, %v487_v48 }
 0x1ed   : > { %v500_v50 = vmul.f32 1.442695, %v495_v49 }
 0x1ee   : > { %v490_v51 = vpop.xlane.xlu1 %489 }
 0x1ef   : > { %1045 = vpow2.f32 %v500_v50  ;;  %v496_v52 = vsub.f32 %v479_v27, %v490_v51 }
 0x1f1   : > { %v502_v53 = vmul.f32 1.442695, %v496_v52 }
 0x1f2   : > { %v493_v54 = vpop.xlane.xlu1 %492 }
 0x1f3   : > { %1047 = vpow2.f32 %v502_v53  ;;  %v497_v55 = vsub.f32 %v480_v29, %v493_v54 }
 0x1f5   : > { %v1044_v56 = vpop.eup %1043  ;;  %v504_v57 = vmul.f32 1.442695, %v497_v55 }
 0x1f6   : > { %v506_v58 = vsel %vm481_vm2, %v1044_v56, 0.0  ;;  %v522_v59 = vpack.c.bf16 %v1044_v56, %v1044_v56 }
 0x1f7   : > { %1049 = vpow2.f32 %v504_v57  ;;  %507 = vadd.xlane.f32.xlu0 %v506_v58 }
 0x1f8   : > { %944 = vmatmul.mubr.msk.bf16.vlgmr.msra.gmra.mrb[8].mxu0 %vm481_vm2, %v522_v59 }
 0x1f9   : > { %v1046_v60 = vpop.eup %1045  ;;  %954 = vmatpush3.bf16.msra.mxu0 %v623_v42  ;;  %955 = vmatprep.mubr.msk.bf16.mxu0 %vm1243_vm0, %v1242_v0 }
 0x1fa   : > { %v509_v61 = vsel %vm481_vm2, %v1046_v60, 0.0  ;;  %v523_v62 = vpack.c.bf16 %v1046_v60, %v1046_v60 }
 0x1fb   : > { %510 = vadd.xlane.f32.xlu1 %v509_v61 }
 0x1fc   : > { %950 = vmatmul.mubr.msk.bf16.vlgmr.msra.gmra.mrb[8].mxu1 %vm481_vm2, %v523_v62 }
 0x1fd   : > { %v1048_v63 = vpop.eup %1047  ;;  %960 = vmatpush3.bf16.msra.mxu1 %v669_v44  ;;  %961 = vmatprep.mubr.msk.bf16.mxu1 %vm1243_vm0, %v1242_v0 }
 0x1fe   : > { %v512_v1 = vsel %vm481_vm2, %v1048_v63, 0.0  ;;  %v524_v2 = vpack.c.bf16 %v1048_v63, %v1048_v63 }
 0x1ff   : > { %513 = vadd.xlane.f32.xlu0 %v512_v1 }
 0x200   : > { %956 = vmatmul.mubr.msk.bf16.vlgmr.msra.gmra.mrb[12].mxu0 %vm481_vm2, %v524_v2 }
 0x201   : > { %v1050_v3 = vpop.eup %1049 }
 0x202   : > { %v515_v4 = vsel %vm481_vm2, %v1050_v3, 0.0  ;;  %v525_v5 = vpack.c.bf16 %v1050_v3, %v1050_v3 }
 0x203   : > { %516 = vadd.xlane.f32.xlu1 %v515_v4 }
 0x204   : > { %962 = vmatmul.mubr.msk.bf16.vlgmr.msra.gmra.mrb[12].mxu1 %vm481_vm2, %v525_v5 }
 0x284   : > { %v508_v6 = vpop.xlane.xlu0 %507 }
 0x285   : > { %1051 = vrcp.f32 %v508_v6 }
 0x288   : > { %v511_v7 = vpop.xlane.xlu1 %510 }
 0x289   : > { %1053 = vrcp.f32 %v511_v7 }
 0x28c   : > { %v514_v8 = vpop.xlane.xlu0 %513 }
 0x28d   : > { %1055 = vrcp.f32 %v514_v8 }
 0x28f   : > { %v1052_v9 = vpop.eup %1051 }
 0x290   : > { %v517_v0 = vpop.xlane.xlu1 %516 }
 0x291   : > { %1057 = vrcp.f32 %v517_v0 }
 0x293   : > { %v1054_v15 = vpop.eup %1053 }
 0x297   : > { %v1056_v21 = vpop.eup %1055 }
 0x29b   : > { %v1058_v27 = vpop.eup %1057 }
 0x2cb   : > { %v567_v10 = vpop.f32.mrb[8].mxu0 }
 0x2cc   : > { %v712_v11 = vmul.f32 %v1052_v9, %v567_v10  ;;  %v945_v12 = vpop.f32.mrb[9].mxu0 }
 0x2cd   : > { %v570_v13 = vpop.f32.mrb[10].mxu0 }
 0x2ce   : > { %719 = vst.msk [vmem:[%s282_s16] sm:$0xff] %vm292_vm1, %v712_v11  ;;  %v946_v14 = vpop.f32.mrb[11].mxu0 }
 0x2cf   : > { %v613_v16 = vpop.f32.mrb[8].mxu1 }
 0x2d0   : > { %v714_v17 = vmul.f32 %v1054_v15, %v613_v16  ;;  %v951_v18 = vpop.f32.mrb[9].mxu1 }
 0x2d1   : > { %v616_v19 = vpop.f32.mrb[10].mxu1 }
 0x2d2   : > { %720 = vst.msk [vmem:[%s282_s16 + $0x8] sm:$0xff] %vm292_vm1, %v714_v17  ;;  %v952_v20 = vpop.f32.mrb[11].mxu1 }
 0x2d3   : > { %v659_v22 = vpop.f32.mrb[12].mxu0 }
 0x2d4   : > { %v716_v23 = vmul.f32 %v1056_v21, %v659_v22  ;;  %v957_v24 = vpop.f32.mrb[13].mxu0 }
 0x2d5   : > { %v662_v25 = vpop.f32.mrb[14].mxu0 }
 0x2d6   : > { %721 = vst.msk [vmem:[%s282_s16 + $0x10] sm:$0xff] %vm292_vm1, %v716_v23  ;;  %v958_v26 = vpop.f32.mrb[15].mxu0 }
 0x2d7   : > { %v705_v28 = vpop.f32.mrb[12].mxu1 }
 0x2d8   : > { %v718_v29 = vmul.f32 %v1058_v27, %v705_v28  ;;  %v963_v30 = vpop.f32.mrb[13].mxu1 }
 0x2d9   : > { %v708_v31 = vpop.f32.mrb[14].mxu1 }
 0x2da   : > { %722 = vst.msk [vmem:[%s282_s16 + $0x18] sm:$0xff] %vm292_vm1, %v718_v29  ;;  %v964_v32 = vpop.f32.mrb[15].mxu1 }
 0x2db   : > { %1162 = shalt.err (!%p1159_p13)
}
 0x2dc   : > { %s1163_s29 = scalar_lea.hbm %s1555_s6, 512  ;;  %s1167_s4 = scalar_lea.hbm %s1608_s3, 1024 }
 0x2dd   : > { %p1164_p11 = scmp.ne.s32.totalorder %s1555_s6, %s1163_s29  ;;  %p1168_p7 = scmp.lt.u32.totalorder %s1555_s6, %s1608_s3 }
 0x2de   : > { %p1169_p4 = scmp.lt.u32.totalorder %s1167_s4, %s1163_s29  ;;  %p1171_p0 = scmp.lt.u32.totalorder %s1163_s29, %s1555_s6 }
 0x2df   : > { %p1165_p2 = pnand %p1164_p11, %p1637_p10 }
 0x2e0   : > { %p1170_p3 = por %p1169_p4, %p1168_p7 }
 0x2e1   : > { %p1166_p5 = pneg %p1165_p2 }
 0x2e2   : > { %p1172_p8 = por %p1171_p0, %p1170_p3 }
 0x2e4   : > { %p1173_p9 = pnand %p1172_p8, %p1166_p5 }
 0x2e6   : > { %1176 = shalt.err (!%p1173_p9)
}
 0x2e7   : > { %s1245_s19 = smov 128   ;;  %s1246_s9 = smov 8  }
 0x2e8   : > { %971 = dma.vmem_to_hbm [thread:$0]  (%p1637_p10), %s1549_s20, 512, %s1555_s6, %s724_s15, %s1245_s19, %s1245_s19, %s1246_s9  }
 0x2e9 PF: > { %s753_s18 = sand.u32 1, %s1215_s12   ;;  %p1638_p12 = scmp.ne.s32.totalorder %s1625_s27, 0 }
 0x2ea   : > { %p1639_p1 = scmp.ge.s32.totalorder %s1235_s17, 2  ;;  %s754_s24 = scalar_lea.sflag [#allocation4], %s753_s18 }
 0x2ec   : > { %p984_p6 = pnand %p1639_p1, %p1638_p12 }
 0x2ee   : > { %1210 = dma.done.wait (!%p984_p6), %s754_s24, 512  }
 0x2ef   : > { %1212 = vsyncadd (!%p984_p6), %s754_s24, 4294966784  ;;  %s22_s17 = sadd.s32 1, %s1235_s17   ;;  %s1640_s16 = sld [smem:[#allocation14_spill]] }
 0x2f0   : > { %p19_p13 = scmp.ge.s32.totalorder %s22_s17, 4   ;;  %s1641_s15 = sld [smem:[#allocation12_spill]] }
 0x2f1   : > { %s1642_s25 = sld [smem:[#allocation13_spill]]  ;;  %s1643_s12 = smov %s1219_s13 }
 0x2f2   : > { %s1644_s13 = smov %s1223_s14  ;;  %21 = sbr.rel (!%p19_p13) target bundleno = 10 (0xa), region = 101 }
 0x2f5   : > { %s1645_s14 = smov %s1640_s16 }
 0x2f7   : > { %s1646_s16 = smov %s1642_s25 }
 0x2f9   :  { %759 = vsyncpa [#allocation3], 1 }
 0x2fa   :  { %761 = vsyncpa [#allocation3 + $0x1], 1 }
 0x2fb   :  { %762 = vsyncpa [#allocation6], 1 }
 0x2fc   :  { %764 = vsyncpa [#allocation6 + $0x1], 1 }
 0x2fd   :  { %765 = vsyncpa [#allocation4], 1 }
 0x2fe   :  { %767 = vsyncpa [#allocation4 + $0x1], 1 }

</bundles_post_ra>
